<compile_context>
chip_gen: v7x
topology: tpu7x:2x2x1
jax: 0.10.0
libtpu: 0.0.40
codegen_flags: <defaults>
</compile_context>

<pallas_src>
import functools

import jax
import jax.numpy as jnp
from jax.experimental import pallas as pl
from jax.experimental.pallas import tpu as pltpu


def _round_up(x, m):
    return ((x + m - 1) // m) * m


def critic_kernel(xt_ref, w1_ref, b1_ref, w2_ref, b2_ref, w3_ref, b3_ref, o_ref):
    """One batch tile.

    xt_ref : [state_dim, TILE_B]   (compute dtype, batch on lanes)
    w1_ref : [net_width, state_dim]
    w2_ref : [net_width, net_width]
    b1/b2  : [net_width, 1]  f32
    w3_ref : [net_width, 1]  f32
    b3_ref : [1, 1]          f32
    o_ref  : [1, TILE_B]     f32   (lane-dense output slab)
    """
    compute_dtype = w1_ref.dtype

    # Layer 1: [net_width, state_dim] @ [state_dim, TILE_B] on the MXU,
    # f32 accumulation; bias add + tanh stay in f32 (EUP).
    h1 = jnp.tanh(
        jnp.dot(w1_ref[...], xt_ref[...], preferred_element_type=jnp.float32)
        + b1_ref[...]
    )

    # Layer 2: same shape, cast activation back to the streaming dtype for MXU.
    h2 = jnp.tanh(
        jnp.dot(w2_ref[...], h1.astype(compute_dtype),
                preferred_element_type=jnp.float32)
        + b2_ref[...]
    )

    # Layer 3 (out_features == 1): VPU multiply + sublane reduce instead of a
    # degenerate 1-wide MXU matmul.  Result is [1, TILE_B] -> lane-dense store.
    v = jnp.sum(h2 * w3_ref[...], axis=0, keepdims=True) + b3_ref[...]
    o_ref[...] = v.astype(o_ref.dtype)


@functools.partial(jax.jit, static_argnames=("compute_dtype", "max_tile_b"))
def critic_forward(state, params, *, compute_dtype=jnp.bfloat16, max_tile_b=1024):
    """state: [B, state_dim] f32. Returns [B, 1] f32."""
    w1, b1, w2, b2, w3, b3 = params
    B, state_dim = state.shape
    net_width = w1.shape[0]

    # Pick a lane-aligned batch tile (multiple of 128), big to amortize the
    # ~0.35us per-grid-step overhead; per-row VMEM cost here is tiny.
    tile_b = min(max_tile_b, _round_up(B, 128))
    padded_b = _round_up(B, tile_b)
    num_tiles = padded_b // tile_b

    # Transpose to batch-on-lanes and zero-pad the batch axis.
    xt = state.T  # [state_dim, B]
    if padded_b != B:
        xt = jnp.pad(xt, ((0, 0), (0, padded_b - B)))

    # Memory-bound: stream state / big weights in bf16 (f32 accumulation in
    # kernel).  Biases and the tiny final-layer weight stay f32.
    xt = xt.astype(compute_dtype)
    w1c = w1.astype(compute_dtype)
    w2c = w2.astype(compute_dtype)

    out = pl.pallas_call(
        critic_kernel,
        out_shape=jax.ShapeDtypeStruct((1, padded_b), jnp.float32),
        grid=(num_tiles,),
        in_specs=[
            # state^T streams over the grid
            pl.BlockSpec((state_dim, tile_b), lambda i: (0, i)),
            # weights / biases stay resident across grid steps
            pl.BlockSpec((net_width, state_dim), lambda i: (0, 0)),
            pl.BlockSpec((net_width, 1), lambda i: (0, 0)),
            pl.BlockSpec((net_width, net_width), lambda i: (0, 0)),
            pl.BlockSpec((net_width, 1), lambda i: (0, 0)),
            pl.BlockSpec((net_width, 1), lambda i: (0, 0)),
            pl.BlockSpec((1, 1), lambda i: (0, 0)),
        ],
        out_specs=pl.BlockSpec((1, tile_b), lambda i: (0, i)),
        compiler_params=pltpu.CompilerParams(
            dimension_semantics=("parallel",),  # shards batch across v7x's 2 TCs
        ),
    )(xt, w1c, b1, w2c, b2, w3, b3)

    return out[0, :B].reshape(B, 1)


def init_critic_params(key, state_dim, net_width):
    """nn.Linear-style init (U[-1/sqrt(fan_in), 1/sqrt(fan_in)]).

    Weights are stored in PyTorch layout [out_features, in_features];
    biases as column vectors [out_features, 1].
    """
    ks = jax.random.split(key, 6)

    def linear(kw, kb, fan_in, fan_out):
        bound = 1.0 / jnp.sqrt(fan_in)
        w = jax.random.uniform(kw, (fan_out, fan_in), jnp.float32, -bound, bound)
        b = jax.random.uniform(kb, (fan_out, 1), jnp.float32, -bound, bound)
        return w, b

    w1, b1 = linear(ks[0], ks[1], state_dim, net_width)
    w2, b2 = linear(ks[2], ks[3], net_width, net_width)
    w3, b3 = linear(ks[4], ks[5], net_width, 1)
    # Final-layer weight kept as a column [net_width, 1] for the VPU-reduce form.
    return (w1, b1, w2, b2, w3.T, b3)


def critic_reference(state, params, compute_dtype=jnp.float32):
    """Pure-JAX reference mirroring the PyTorch forward."""
    w1, b1, w2, b2, w3, b3 = params
    x = state.astype(compute_dtype)
    h1 = jnp.tanh(
        jnp.dot(x, w1.astype(compute_dtype).T, preferred_element_type=jnp.float32)
        + b1.T
    )
    h2 = jnp.tanh(
        jnp.dot(h1.astype(compute_dtype), w2.astype(compute_dtype).T,
                preferred_element_type=jnp.float32)
        + b2.T
    )
    return h2 @ w3 + b3.T


if __name__ == "__main__":
    key = jax.random.PRNGKey(0)
    k_param, k_state = jax.random.split(key)

    batch = 8
    state_dim = 16
    net_width = 32

    params = init_critic_params(k_param, state_dim, net_width)
    state = jax.random.normal(k_state, (batch, state_dim), jnp.float32)

    ref_f32 = critic_reference(state, params, compute_dtype=jnp.float32)

    # Optimized (bf16-streamed) path.
    out_bf16 = jax.block_until_ready(
        critic_forward(state, params, compute_dtype=jnp.bfloat16)
    )
    assert out_bf16.shape == (batch, 1), out_bf16.shape
    assert jnp.allclose(out_bf16, ref_f32, atol=3e-2, rtol=3e-2), (out_bf16, ref_f32)

    # Full-f32 path for tight numerical check.
    out_f32 = jax.block_until_ready(
        critic_forward(state, params, compute_dtype=jnp.float32)
    )
    assert out_f32.shape == (batch, 1), out_f32.shape
    assert jnp.allclose(out_f32, ref_f32, atol=1e-4, rtol=1e-4), (out_f32, ref_f32)

    print("KERNEL_OK")
</pallas_src>

<mosaic_0001>
module attributes {stable_mosaic.version = 11 : i64} {
  func.func @critic_kernel(%arg0: i32, %arg1: memref<16x128xbf16, #tpu.memory_space<vmem>>, %arg2: memref<32x16xbf16, #tpu.memory_space<vmem>>, %arg3: memref<32x1xf32, #tpu.memory_space<vmem>>, %arg4: memref<32x32xbf16, #tpu.memory_space<vmem>>, %arg5: memref<32x1xf32, #tpu.memory_space<vmem>>, %arg6: memref<32x1xf32, #tpu.memory_space<vmem>>, %arg7: memref<1x1xf32, #tpu.memory_space<vmem>>, %arg8: memref<1x128xf32, #tpu.memory_space<vmem>>) attributes {dimension_semantics = [#tpu.dimension_semantics<parallel>], iteration_bounds = array<i64: 1>, scalar_prefetch = 0 : i64, scratch_operands = 0 : i64, tpu.core_type = #tpu.core_type<tc>, window_params = [{transform_indices = @transform_0, window_bounds = array<i64: 16, 128>}, {pipeline_mode = #tpu.pipeline_mode<synchronous>, transform_indices = @transform_1, window_bounds = array<i64: 32, 16>}, {pipeline_mode = #tpu.pipeline_mode<synchronous>, transform_indices = @transform_2, window_bounds = array<i64: 32, 1>}, {pipeline_mode = #tpu.pipeline_mode<synchronous>, transform_indices = @transform_3, window_bounds = array<i64: 32, 32>}, {pipeline_mode = #tpu.pipeline_mode<synchronous>, transform_indices = @transform_4, window_bounds = array<i64: 32, 1>}, {pipeline_mode = #tpu.pipeline_mode<synchronous>, transform_indices = @transform_5, window_bounds = array<i64: 32, 1>}, {pipeline_mode = #tpu.pipeline_mode<synchronous>, transform_indices = @transform_6, window_bounds = array<i64: 1, 1>}, {transform_indices = @transform_7, window_bounds = array<i64: 1, 128>}]} {
    %c0 = arith.constant 0 : index
    %c0_0 = arith.constant 0 : index
    %0 = vector.load %arg2[%c0, %c0_0] : memref<32x16xbf16, #tpu.memory_space<vmem>>, vector<32x16xbf16>
    %c0_1 = arith.constant 0 : index
    %c0_2 = arith.constant 0 : index
    %1 = vector.load %arg1[%c0_1, %c0_2] : memref<16x128xbf16, #tpu.memory_space<vmem>>, vector<16x128xbf16>
    %cst = arith.constant dense<0.000000e+00> : vector<32x128xf32>
    %2 = tpu.matmul %0, %1, %cst {dimension_numbers = #tpu.dot_dimension_numbers<[1], [0], [0], [1], [0, 0, 1, 1], [], []>} : vector<32x16xbf16>, vector<16x128xbf16>, vector<32x128xf32> -> vector<32x128xf32>
    %c0_3 = arith.constant 0 : index
    %c0_4 = arith.constant 0 : index
    %3 = vector.load %arg3[%c0_3, %c0_4] : memref<32x1xf32, #tpu.memory_space<vmem>>, vector<32x1xf32>
    %4 = vector.broadcast %3 : vector<32x1xf32> to vector<32x128xf32>
    %5 = arith.addf %2, %4 : vector<32x128xf32>
    %6 = math.tanh %5 : vector<32x128xf32>
    %c0_5 = arith.constant 0 : index
    %c0_6 = arith.constant 0 : index
    %7 = vector.load %arg4[%c0_5, %c0_6] : memref<32x32xbf16, #tpu.memory_space<vmem>>, vector<32x32xbf16>
    %8 = arith.truncf %6 : vector<32x128xf32> to vector<32x128xbf16>
    %cst_7 = arith.constant dense<0.000000e+00> : vector<32x128xf32>
    %9 = tpu.matmul %7, %8, %cst_7 {dimension_numbers = #tpu.dot_dimension_numbers<[1], [0], [0], [1], [0, 0, 1, 1], [], []>} : vector<32x32xbf16>, vector<32x128xbf16>, vector<32x128xf32> -> vector<32x128xf32>
    %c0_8 = arith.constant 0 : index
    %c0_9 = arith.constant 0 : index
    %10 = vector.load %arg5[%c0_8, %c0_9] : memref<32x1xf32, #tpu.memory_space<vmem>>, vector<32x1xf32>
    %11 = vector.broadcast %10 : vector<32x1xf32> to vector<32x128xf32>
    %12 = arith.addf %9, %11 : vector<32x128xf32>
    %13 = math.tanh %12 : vector<32x128xf32>
    %c0_10 = arith.constant 0 : index
    %c0_11 = arith.constant 0 : index
    %14 = vector.load %arg6[%c0_10, %c0_11] : memref<32x1xf32, #tpu.memory_space<vmem>>, vector<32x1xf32>
    %15 = vector.broadcast %14 : vector<32x1xf32> to vector<32x128xf32>
    %16 = arith.mulf %13, %15 : vector<32x128xf32>
    %cst_12 = arith.constant dense<0.000000e+00> : vector<128xf32>
    %17 = vector.multi_reduction <add>, %16, %cst_12 [0] : vector<32x128xf32> to vector<128xf32>
    %18 = vector.shape_cast %17 : vector<128xf32> to vector<1x128xf32>
    %c0_13 = arith.constant 0 : index
    %c0_14 = arith.constant 0 : index
    %19 = vector.load %arg7[%c0_13, %c0_14] : memref<1x1xf32, #tpu.memory_space<vmem>>, vector<1x1xf32>
    %20 = vector.broadcast %19 : vector<1x1xf32> to vector<1x128xf32>
    %21 = arith.addf %18, %20 : vector<1x128xf32>
    %c0_15 = arith.constant 0 : index
    %c0_16 = arith.constant 0 : index
    %22 = vector.load %arg8[%c0_15, %c0_16] : memref<1x128xf32, #tpu.memory_space<vmem>>, vector<1x128xf32>
    tpu.vector_store %arg8[%c0_15, %c0_16], %21 {strides = array<i32>} : memref<1x128xf32, #tpu.memory_space<vmem>>, vector<1x128xf32>,
    return
  }
  func.func @transform_0(%arg0: i32) -> (i32, i32) {
    %c0_i32 = arith.constant 0 : i32
    %c0_i32_0 = arith.constant 0 : i32
    return %c0_i32, %arg0 : i32, i32
  }
  func.func @transform_1(%arg0: i32) -> (i32, i32) {
    %c0_i32 = arith.constant 0 : i32
    %c0_i32_0 = arith.constant 0 : i32
    %c0_i32_1 = arith.constant 0 : i32
    return %c0_i32, %c0_i32_0 : i32, i32
  }
  func.func @transform_2(%arg0: i32) -> (i32, i32) {
    %c0_i32 = arith.constant 0 : i32
    %c0_i32_0 = arith.constant 0 : i32
    %c0_i32_1 = arith.constant 0 : i32
    return %c0_i32, %c0_i32_0 : i32, i32
  }
  func.func @transform_3(%arg0: i32) -> (i32, i32) {
    %c0_i32 = arith.constant 0 : i32
    %c0_i32_0 = arith.constant 0 : i32
    %c0_i32_1 = arith.constant 0 : i32
    return %c0_i32, %c0_i32_0 : i32, i32
  }
  func.func @transform_4(%arg0: i32) -> (i32, i32) {
    %c0_i32 = arith.constant 0 : i32
    %c0_i32_0 = arith.constant 0 : i32
    %c0_i32_1 = arith.constant 0 : i32
    return %c0_i32, %c0_i32_0 : i32, i32
  }
  func.func @transform_5(%arg0: i32) -> (i32, i32) {
    %c0_i32 = arith.constant 0 : i32
    %c0_i32_0 = arith.constant 0 : i32
    %c0_i32_1 = arith.constant 0 : i32
    return %c0_i32, %c0_i32_0 : i32, i32
  }
  func.func @transform_6(%arg0: i32) -> (i32, i32) {
    %c0_i32 = arith.constant 0 : i32
    %c0_i32_0 = arith.constant 0 : i32
    %c0_i32_1 = arith.constant 0 : i32
    return %c0_i32, %c0_i32_0 : i32, i32
  }
  func.func @transform_7(%arg0: i32) -> (i32, i32) {
    %c0_i32 = arith.constant 0 : i32
    %c0_i32_0 = arith.constant 0 : i32
    return %c0_i32, %arg0 : i32, i32
  }
}

</mosaic_0001>

<bundles_post_ra>
// kernel: critic_forward.1
= control target key start
LH: loop header
LB: loop body
LE: loop exit
PB: predicated region body
PF: predicated region fallthrough
CT: control target
= control target key end

     0   :  { %vm75_vm0 = vcmask 130048   ;;  %v342_v1 = vmov 0   ;;  %vm175_vm1 = vcmask 261120   ;;  %s444_s0 = inlined_call_operand.vmem [shape: bf16[16,128], index: 0, kind: input, shape index: {}]   ;;  %s445_s1 = inlined_call_operand.vmem [shape: bf16[32,16], index: 1, kind: input, shape index: {}]   ;;  %s446_s6 = inlined_call_operand.<no memory space> [shape: f32[1,1], index: 6, kind: input, shape index: {}]   ;;  %s447_s2 = inlined_call_operand.vmem [shape: f32[32,1], index: 2, kind: input, shape index: {}]   ;;  %s448_s4 = inlined_call_operand.vmem [shape: f32[32,1], index: 4, kind: input, shape index: {}]   ;;  %s449_s5 = inlined_call_operand.vmem [shape: f32[32,1], index: 5, kind: input, shape index: {}]   ;;  %s450_s3 = inlined_call_operand.vmem [shape: bf16[32,32], index: 3, kind: input, shape index: {}]   ;;  %s451_s7 = inlined_call_operand.vmem [shape: f32[1,128], index: 7, kind: output, shape index: {}]  }
   0x1   :  { %v321_v0 = vld [vmem:[%s444_s0] sm:$0xff]   ;;  %319 = vset.pattern.permute.xlu0 %v342_v1  ;;  %320 = vset.pattern.permute.xlu1 %v342_v1  ;;  %v12_v2 = vstv %s446_s6  ;;  %v323_v4 = vld [vmem:[%s445_s1 + $0x8] sm:$0xff]   ;;  %v37_v6 = vld [vmem:[%s447_s2 + $0x10] sm:$0xff] }
   0x2   :  { %v322_v3 = vld [vmem:[%s445_s1] sm:$0xff]   ;;  %13 = vst [vmem:[#allocation2] sm:$0x1] %v12_v2  ;;  %304 = vmatprep.subr.bf16.mxu0 %v321_v0  ;;  %51 = vperm.xlu1 %320, %v37_v6   ;;  %v36_v7 = vld [vmem:[%s447_s2 + $0x8] sm:$0xff]  ;;  %v38_v8 = vld [vmem:[%s447_s2 + $0x18] sm:$0xff] }
   0x3   :  { %305 = vmatpush3.bf16.msra.mxu0 %v321_v0  ;;  %306 = vmatprep.mubr.msk.bf16.mxu0 %vm75_vm0, %v322_v3  ;;  %v35_v5 = vld [vmem:[%s447_s2] sm:$0xff]  ;;  %v142_v10 = vld [vmem:[%s448_s4 + $0x8] sm:$0xff]  ;;  %v143_v11 = vld [vmem:[%s448_s4 + $0x10] sm:$0xff]  ;;  %v278_v0 = vlaneseq }
   0x4   :  { %41 = vperm.xlu0 %319, %v35_v5   ;;  %v141_v9 = vld [vmem:[%s448_s4] sm:$0xff]  ;;  %v144_v12 = vld [vmem:[%s448_s4 + $0x18] sm:$0xff]  ;;  %v236_v14 = vld [vmem:[%s449_s5 + $0x8] sm:$0xff] }
   0x5   :  { %v235_v13 = vld [vmem:[%s449_s5] sm:$0xff]  ;;  %v237_v15 = vld [vmem:[%s449_s5 + $0x10] sm:$0xff]  ;;  %v238_v16 = vld [vmem:[%s449_s5 + $0x18] sm:$0xff]  ;;  %v279_v3 = vshrl.u32 %v278_v0, 7 }
   0x6   :  { %307 = vmatmul.mubr.msk.bf16.vlgmr.msra.gmra.mrb[0].mxu0 %vm75_vm0, %v323_v4  ;;  %56 = vperm.xlu1 %320, %v38_v8   ;;  %v324_v18 = vld [vmem:[%s450_s3] sm:$0xff]   ;;  %v325_v37 = vld [vmem:[%s450_s3 + $0x8] sm:$0xff]  }
   0x7   :  { %314 = vmatprep.mubr.msk.bf16.mxu1 %vm175_vm1, %v324_v18  ;;  %v280_v6 = vsub.s32 0, %v279_v3 }
   0x8   :  { %46 = vperm.xlu0 %319, %v36_v7  }
   0x9   :  { %v272_v17 = vld [vmem:[#allocation2] sm:$0x1] }
   0xa   :  { %152 = vperm.xlu1 %320, %v142_v10  }
   0xc   :  { %147 = vperm.xlu0 %319, %v141_v9  }
   0xe   :  { %162 = vperm.xlu1 %320, %v144_v12  }
  0x10   :  { %157 = vperm.xlu0 %319, %v143_v11  }
  0x12   :  { %246 = vperm.xlu1 %320, %v236_v14  }
  0x14   :  { %241 = vperm.xlu0 %319, %v235_v13  }
  0x16   :  { %256 = vperm.xlu1 %320, %v238_v16  }
  0x18   :  { %251 = vperm.xlu0 %319, %v237_v15  }
  0x1c   :  { %275 = vperm.xlu0 %319, %v272_v17  }
  0x81   :  { %v52_v19 = vpop.permute.xlu1 %51 }
  0x83   :  { %v42_v20 = vpop.permute.xlu0 %41 }
  0x85   :  { %v57_v24 = vpop.permute.xlu1 %56 }
  0x87   :  { %v47_v27 = vpop.permute.xlu0 %46 }
  0x89   :  { %v153_v39 = vpop.permute.xlu1 %152 }
  0x8b   :  { %v148_v38 = vpop.permute.xlu0 %147 }
  0x8d   :  { %v163_v46 = vpop.permute.xlu1 %162 }
  0x8f   :  { %v158_v40 = vpop.permute.xlu0 %157 }
  0x91   :  { %v247_v52 = vpop.permute.xlu1 %246 }
  0x93   :  { %v242_v50 = vpop.permute.xlu0 %241 }
  0x95   :  { %v257_v61 = vpop.permute.xlu1 %256 }
  0x97   :  { %v252_v58 = vpop.permute.xlu0 %251 }
  0x9b   :  { %v276_v8 = vpop.permute.xlu0 %275 }
  0x9c   :  { %v281_v10 = vrot.slane %v276_v8, %v280_v6 }
  0xd9   :  { %v308_v21 = vpop.f32.mrb[0].mxu0 }
  0xda   :  { %v125_v22 = vadd.f32 %v308_v21, %v52_v19  ;;  %v116_v23 = vpop.f32.mrb[1].mxu0 }
  0xdb   :  { %v117_v25 = vadd.f32 %v116_v23, %v42_v20  ;;  %v309_v26 = vpop.f32.mrb[2].mxu0 }
  0xdc   :  { %326 = vtanh.f32 %v125_v22  ;;  %v128_v28 = vadd.f32 %v309_v26, %v57_v24  ;;  %v119_v29 = vpop.f32.mrb[3].mxu0 }
  0xdd   :  { %328 = vtanh.f32 %v117_v25  ;;  %v120_v30 = vadd.f32 %v119_v29, %v47_v27 }
  0xde   :  { %330 = vtanh.f32 %v128_v28 }
  0xdf   :  { %332 = vtanh.f32 %v120_v30 }
  0xe6   :  { %v327_v31 = vpop.eup %326 }
  0xe7   :  { %v329_v32 = vpop.eup %328 }
  0xe8   :  { %v331_v33 = vpop.eup %330 }
  0xe9   :  { %v333_v34 = vpop.eup %332  ;;  %v140_v35 = vpack.c.bf16 %v331_v33, %v327_v31 }
  0xea   :  { %v139_v36 = vpack.c.bf16 %v333_v34, %v329_v32 }
  0xec   :  { %310 = vmatprep.subr.bf16.mxu1 %v139_v36 }
  0xed   :  { %311 = vmatpush3.bf16.msra.mxu1 %v139_v36 }
  0xee   :  { %312 = vmatprep.subr.bf16.mxu1 %v140_v35 }
  0xf1   :  { %313 = vmatpush3.bf16.msra.mxu1 %v140_v35 }
  0xf4   :  { %315 = vmatmul.mubr.msk.bf16.vlgmr.msra.gmra.mrb[0].mxu1 %vm175_vm1, %v325_v37 }
 0x1c7   :  { %v316_v41 = vpop.f32.mrb[0].mxu1 }
 0x1c8   :  { %v225_v42 = vadd.f32 %v316_v41, %v158_v40  ;;  %v216_v43 = vpop.f32.mrb[1].mxu1 }
 0x1c9   :  { %v217_v44 = vadd.f32 %v216_v43, %v148_v38  ;;  %v317_v45 = vpop.f32.mrb[2].mxu1 }
 0x1ca   :  { %v219_v47 = vpop.f32.mrb[3].mxu1  ;;  %v228_v48 = vadd.f32 %v317_v45, %v163_v46 }
 0x1cb   :  { %334 = vtanh.f32 %v217_v44  ;;  %v220_v49 = vadd.f32 %v219_v47, %v153_v39 }
 0x1cc   :  { %336 = vtanh.f32 %v225_v42 }
 0x1cd   :  { %338 = vtanh.f32 %v220_v49 }
 0x1ce   :  { %340 = vtanh.f32 %v228_v48 }
 0x1d5   :  { %v335_v51 = vpop.eup %334 }
 0x1d6   :  { %v337_v53 = vpop.eup %336  ;;  %v259_v55 = vmul.f32 %v335_v51, %v242_v50 }
 0x1d7   :  { %v339_v54 = vpop.eup %338  ;;  %v261_v59 = vmul.f32 %v337_v53, %v252_v58 }
 0x1d8   :  { %v260_v56 = vmul.f32 %v339_v54, %v247_v52  ;;  %v341_v57 = vpop.eup %340 }
 0x1d9   :  { %v262_v62 = vmul.f32 %v341_v57, %v257_v61 }
 0x1da   :  { %v263_v60 = vadd.f32 %v260_v56, %v259_v55 }
 0x1dc   :  { %v264_v63 = vadd.f32 %v263_v60, %v261_v59 }
 0x1de   :  { %v265_v1 = vadd.f32 %v264_v63, %v262_v62 }
 0x1e0   :  { %v266_v2 = vrot.slane %v265_v1, 4 }
 0x1e2   :  { %v267_v4 = vadd.f32 %v266_v2, %v265_v1 }
 0x1e4   :  { %v268_v5 = vrot.slane %v267_v4, 2 }
 0x1e6   :  { %v269_v7 = vadd.f32 %v268_v5, %v267_v4 }
 0x1e8   :  { %v270_v9 = vrot.slane %v269_v7, 1 }
 0x1ea   :  { %v271_v11 = vadd.f32 %v270_v9, %v269_v7 }
 0x1ec   :  { %v282_v12 = vadd.f32 %v281_v10, %v271_v11 }
 0x1ee   :  { %283 = vst [vmem:[%s451_s7] sm:$0x1] %v282_v12 }

</bundles_post_ra>
